<compile_context>
chip_gen: v7x
topology: tpu7x:2x2x1
jax: 0.10.0
libtpu: 0.0.40
codegen_flags: <defaults>
</compile_context>

<pallas_src>
import jax
import jax.numpy as jnp
from jax.experimental import pallas as pl
from jax.experimental.pallas import tpu as pltpu


def _round_up(v, m):
    return (v + m - 1) // m * m


def graphlayer_kernel(x_ref, adj_ref, wt_ref, b_ref, out_ref, h_acc):
    """One (row-tile i, reduction-tile k) grid step.

    h = x @ adj is accumulated on-chip across k; on the last k step the fused
    linear (h @ W^T + b) and ReLU write the lane-dense output tile.
    """
    k = pl.program_id(1)

    @pl.when(k == 0)
    def _():
        h_acc[...] = jnp.zeros_like(h_acc)

    # spmm (dense equivalent): accumulate x-tile @ adj-tile on the MXU.
    h_acc[...] += jnp.dot(x_ref[...], adj_ref[...],
                          preferred_element_type=jnp.float32)

    @pl.when(k == pl.num_programs(1) - 1)
    def _():
        # Finalize: second matmul (weight already transposed in the wrapper),
        # bias add and ReLU -- h never touches HBM.
        y = jnp.dot(h_acc[...], wt_ref[...],
                    preferred_element_type=jnp.float32) + b_ref[...]
        out_ref[...] = jnp.maximum(y, 0.0).astype(out_ref.dtype)


def graphlayer_forward(x, adj, weight, bias, *, tm=256, tk=512,
                       compute_dtype=jnp.float32):
    """relu((x @ adj) @ weight.T + bias), fully fused in one Pallas kernel.

    x      : [N, M]
    adj    : [M, D_in]
    weight : [D_out, D_in]   (PyTorch nn.Linear layout)
    bias   : [D_out]

    compute_dtype: set to jnp.bfloat16 on v6e/v7x for the native MXU rate
    (accumulation stays f32); default f32 keeps bit-tight tolerances.
    """
    N, M = x.shape
    M2, d_in = adj.shape
    d_out, d_in2 = weight.shape
    assert M == M2 and d_in == d_in2

    # ---- one-time layout plumbing in the wrapper (not per grid step) -------
    w_t = weight.T                    # [D_in, D_out]  -> no .T inside kernel
    b2d = bias.reshape(1, d_out)

    # Row tile (multiple of 8 sublanes) and reduction tile (multiple of 128
    # lanes), clamped to the padded problem size so tiny demos still work.
    tm = min(tm, _round_up(N, 8))
    tk = min(tk, _round_up(M, 128))

    # Pad to lane/sublane-friendly, tile-divisible shapes.  Zero padding is
    # exact: padded rows/cols contribute nothing and are sliced off below.
    Np = _round_up(N, tm)
    Mp = _round_up(M, tk)
    Dip = _round_up(d_in, 128)
    Dop = _round_up(d_out, 128)

    xp = jnp.pad(x, ((0, Np - N), (0, Mp - M))).astype(compute_dtype)
    adjp = jnp.pad(adj, ((0, Mp - M), (0, Dip - d_in))).astype(compute_dtype)
    wtp = jnp.pad(w_t, ((0, Dip - d_in), (0, Dop - d_out))).astype(compute_dtype)
    bp = jnp.pad(b2d, ((0, 0), (0, Dop - d_out))).astype(jnp.float32)

    grid = (Np // tm, Mp // tk)

    out_p = pl.pallas_call(
        graphlayer_kernel,
        out_shape=jax.ShapeDtypeStruct((Np, Dop), jnp.float32),
        grid_spec=pltpu.PrefetchScalarGridSpec(
            num_scalar_prefetch=0,
            grid=grid,
            in_specs=[
                pl.BlockSpec((tm, tk), lambda i, k: (i, k)),    # x tile
                pl.BlockSpec((tk, Dip), lambda i, k: (k, 0)),   # adj tile
                pl.BlockSpec((Dip, Dop), lambda i, k: (0, 0)),  # W^T (resident)
                pl.BlockSpec((1, Dop), lambda i, k: (0, 0)),    # bias
            ],
            out_specs=pl.BlockSpec((tm, Dop), lambda i, k: (i, 0)),
            scratch_shapes=[pltpu.VMEM((tm, Dip), jnp.float32)],  # h accumulator
        ),
        compiler_params=pltpu.CompilerParams(
            # Row tiles are independent (megacore-shardable on v7x); the M
            # reduction axis carries the on-chip accumulator.
            dimension_semantics=("parallel", "arbitrary"),
        ),
    )(xp, adjp, wtp, bp)

    return out_p[:N, :d_out]


if __name__ == "__main__":
    # Small shapes consistent with the module:
    #   x: [N, M], adj: [M, input_dim], Linear(input_dim -> output_dim)
    N, M = 8, 16
    input_dim, output_dim = 32, 32

    key = jax.random.PRNGKey(0)
    kx, kadj, kw, kb = jax.random.split(key, 4)

    x = jax.random.normal(kx, (N, M), dtype=jnp.float32)
    # TODO(synk): torch.spmm takes a sparse x; here adj/x are dense, which is
    # semantically identical for a dense adjacency.
    adj = jax.random.normal(kadj, (M, input_dim), dtype=jnp.float32)

    # Deterministic parameter init (PyTorch Linear-like uniform bound).
    bound = 1.0 / (input_dim ** 0.5)
    weight = jax.random.uniform(kw, (output_dim, input_dim),
                                minval=-bound, maxval=bound, dtype=jnp.float32)
    bias = jax.random.uniform(kb, (output_dim,),
                              minval=-bound, maxval=bound, dtype=jnp.float32)

    out = graphlayer_forward(x, adj, weight, bias)
    out = jax.block_until_ready(out)

    # Pure-JAX reference check.
    ref = jnp.maximum((x @ adj) @ weight.T + bias, 0.0)
    assert out.shape == (N, output_dim)
    assert jnp.allclose(out, ref, atol=1e-4, rtol=1e-4)

    print("KERNEL_OK")
</pallas_src>

<mosaic_0001>
module attributes {stable_mosaic.version = 11 : i64} {
  func.func @graphlayer_kernel(%arg0: i32, %arg1: i32, %arg2: memref<8x128xf32, #tpu.memory_space<vmem>>, %arg3: memref<128x128xf32, #tpu.memory_space<vmem>>, %arg4: memref<128x128xf32, #tpu.memory_space<vmem>>, %arg5: memref<1x128xf32, #tpu.memory_space<vmem>>, %arg6: memref<8x128xf32, #tpu.memory_space<vmem>>, %arg7: memref<8x128xf32, #tpu.memory_space<vmem>>) attributes {dimension_semantics = [#tpu.dimension_semantics<parallel>, #tpu.dimension_semantics<arbitrary>], iteration_bounds = array<i64: 1, 1>, scalar_prefetch = 0 : i64, scratch_operands = 1 : i64, tpu.core_type = #tpu.core_type<tc>, window_params = [{transform_indices = @transform_0, window_bounds = array<i64: 8, 128>}, {transform_indices = @transform_1, window_bounds = array<i64: 128, 128>}, {pipeline_mode = #tpu.pipeline_mode<synchronous>, transform_indices = @transform_2, window_bounds = array<i64: 128, 128>}, {pipeline_mode = #tpu.pipeline_mode<synchronous>, transform_indices = @transform_3, window_bounds = array<i64: 1, 128>}, {transform_indices = @transform_4, window_bounds = array<i64: 8, 128>}]} {
    %c0_i32 = arith.constant 0 : i32
    %0 = arith.cmpi eq, %arg1, %c0_i32 : i32
    %1 = arith.extui %0 : i1 to i32
    %c0_i32_0 = arith.constant 0 : i32
    %2 = arith.cmpi ne, %1, %c0_i32_0 : i32
    scf.if %2 {
      %cst_10 = arith.constant 0.000000e+00 : f32
      %12 = vector.broadcast %cst_10 : f32 to vector<8x128xf32>
      %c0_11 = arith.constant 0 : index
      %c0_12 = arith.constant 0 : index
      %13 = vector.load %arg7[%c0_11, %c0_12] : memref<8x128xf32, #tpu.memory_space<vmem>>, vector<8x128xf32>
      tpu.vector_store %arg7[%c0_11, %c0_12], %12 {strides = array<i32>} : memref<8x128xf32, #tpu.memory_space<vmem>>, vector<8x128xf32>,
    } else {
    }
    %c0 = arith.constant 0 : index
    %c0_1 = arith.constant 0 : index
    %3 = vector.load %arg7[%c0, %c0_1] : memref<8x128xf32, #tpu.memory_space<vmem>>, vector<8x128xf32>
    %c0_2 = arith.constant 0 : index
    %c0_3 = arith.constant 0 : index
    %4 = vector.load %arg2[%c0_2, %c0_3] : memref<8x128xf32, #tpu.memory_space<vmem>>, vector<8x128xf32>
    %c0_4 = arith.constant 0 : index
    %c0_5 = arith.constant 0 : index
    %5 = vector.load %arg3[%c0_4, %c0_5] : memref<128x128xf32, #tpu.memory_space<vmem>>, vector<128x128xf32>
    %cst = arith.constant dense<0.000000e+00> : vector<8x128xf32>
    %6 = tpu.matmul %4, %5, %cst {dimension_numbers = #tpu.dot_dimension_numbers<[1], [0], [0], [1], [0, 0, 1, 1], [], []>} : vector<8x128xf32>, vector<128x128xf32>, vector<8x128xf32> -> vector<8x128xf32>
    %7 = arith.addf %3, %6 : vector<8x128xf32>
    %c0_6 = arith.constant 0 : index
    %c0_7 = arith.constant 0 : index
    %8 = vector.load %arg7[%c0_6, %c0_7] : memref<8x128xf32, #tpu.memory_space<vmem>>, vector<8x128xf32>
    tpu.vector_store %arg7[%c0_6, %c0_7], %7 {strides = array<i32>} : memref<8x128xf32, #tpu.memory_space<vmem>>, vector<8x128xf32>,
    %c0_i32_8 = arith.constant 0 : i32
    %9 = arith.cmpi eq, %arg1, %c0_i32_8 : i32
    %10 = arith.extui %9 : i1 to i32
    %c0_i32_9 = arith.constant 0 : i32
    %11 = arith.cmpi ne, %10, %c0_i32_9 : i32
    scf.if %11 {
      %c0_10 = arith.constant 0 : index
      %c0_11 = arith.constant 0 : index
      %12 = vector.load %arg7[%c0_10, %c0_11] : memref<8x128xf32, #tpu.memory_space<vmem>>, vector<8x128xf32>
      %c0_12 = arith.constant 0 : index
      %c0_13 = arith.constant 0 : index
      %13 = vector.load %arg4[%c0_12, %c0_13] : memref<128x128xf32, #tpu.memory_space<vmem>>, vector<128x128xf32>
      %cst_14 = arith.constant dense<0.000000e+00> : vector<8x128xf32>
      %14 = tpu.matmul %12, %13, %cst_14 {dimension_numbers = #tpu.dot_dimension_numbers<[1], [0], [0], [1], [0, 0, 1, 1], [], []>} : vector<8x128xf32>, vector<128x128xf32>, vector<8x128xf32> -> vector<8x128xf32>
      %c0_15 = arith.constant 0 : index
      %c0_16 = arith.constant 0 : index
      %15 = vector.load %arg5[%c0_15, %c0_16] : memref<1x128xf32, #tpu.memory_space<vmem>>, vector<1x128xf32>
      %16 = vector.broadcast %15 : vector<1x128xf32> to vector<8x128xf32>
      %17 = arith.addf %14, %16 : vector<8x128xf32>
      %cst_17 = arith.constant 0.000000e+00 : f32
      %18 = vector.broadcast %cst_17 : f32 to vector<8x128xf32>
      %19 = arith.maximumf %17, %18 : vector<8x128xf32>
      %c0_18 = arith.constant 0 : index
      %c0_19 = arith.constant 0 : index
      %20 = vector.load %arg6[%c0_18, %c0_19] : memref<8x128xf32, #tpu.memory_space<vmem>>, vector<8x128xf32>
      tpu.vector_store %arg6[%c0_18, %c0_19], %19 {strides = array<i32>} : memref<8x128xf32, #tpu.memory_space<vmem>>, vector<8x128xf32>,
    } else {
    }
    return
  }
  func.func @transform_0(%arg0: i32, %arg1: i32) -> (i32, i32) {
    %c0_i32 = arith.constant 0 : i32
    return %arg0, %arg1 : i32, i32
  }
  func.func @transform_1(%arg0: i32, %arg1: i32) -> (i32, i32) {
    %c0_i32 = arith.constant 0 : i32
    %c0_i32_0 = arith.constant 0 : i32
    return %arg1, %c0_i32 : i32, i32
  }
  func.func @transform_2(%arg0: i32, %arg1: i32) -> (i32, i32) {
    %c0_i32 = arith.constant 0 : i32
    %c0_i32_0 = arith.constant 0 : i32
    %c0_i32_1 = arith.constant 0 : i32
    return %c0_i32, %c0_i32_0 : i32, i32
  }
  func.func @transform_3(%arg0: i32, %arg1: i32) -> (i32, i32) {
    %c0_i32 = arith.constant 0 : i32
    %c0_i32_0 = arith.constant 0 : i32
    %c0_i32_1 = arith.constant 0 : i32
    return %c0_i32, %c0_i32_0 : i32, i32
  }
  func.func @transform_4(%arg0: i32, %arg1: i32) -> (i32, i32) {
    %c0_i32 = arith.constant 0 : i32
    %c0_i32_0 = arith.constant 0 : i32
    return %arg0, %c0_i32 : i32, i32
  }
}

</mosaic_0001>

<bundles_post_ra>
// kernel: tpu_custom_call.1
= control target key start
LH: loop header
LB: loop body
LE: loop exit
PB: predicated region body
PF: predicated region fallthrough
CT: control target
= control target key end

     0   :  { %9 = vsyncpa [#allocation4], 0  ;;  %s630_s0 = inlined_call_operand.hbm [shape: f32[8,128], index: 0, kind: input, shape index: {}]   ;;  %s631_s1 = inlined_call_operand.hbm [shape: f32[128,128], index: 1, kind: input, shape index: {}]   ;;  %s632_s2 = inlined_call_operand.hbm [shape: f32[128,128], index: 2, kind: input, shape index: {}]   ;;  %s633_s3 = inlined_call_operand.vmem [shape: f32[1,128], index: 3, kind: input, shape index: {}]   ;;  %s634_s4 = inlined_call_operand.hbm [shape: f32[8,128], index: 4, kind: output, shape index: {}]  }
   0x1   :  { %10 = vsyncpa [#allocation7], 0 }
   0x2   :  { %11 = vsyncpa [#allocation5], 0  ;;  %s523_s15 = smov [#allocation6]   ;;  %s429_s19 = scalar_lea.hbm %s631_s1, 2048 }
   0x3   :  { %s27_s16 = sshll.u32 %s523_s15, 4  ;;  %p430_p0 = scmp.ne.s32.totalorder %s631_s1, %s429_s19  ;;  %s28_s16 = int_to_ptr.vmem [resolvable:$true] %s27_s16 }
   0x4   :  { %p433_p1 = scmp.lt.u32.totalorder %s429_s19, %s631_s1 }
   0x6   :  { %p435_p2 = pnand %p433_p1, %p430_p0 }
   0x8   :  { %438 = shalt.err (!%p435_p2)
}
   0x9   :  { %s439_s24 = scalar_lea.vmem %s28_s16, 2048  ;;  %p444_p4 = scmp.lt.s32.totalorder %s28_s16, %s28_s16 }
   0xa   :  { %p440_p3 = scmp.ne.s32.totalorder %s28_s16, %s439_s24  ;;  %p445_p5 = scmp.lt.s32.totalorder %s439_s24, %s439_s24 }
   0xc   :  { %p446_p6 = por %p445_p5, %p444_p4 }
   0xe   :  { %p447_p7 = pnand %p446_p6, %p440_p3 }
  0x10   :  { %450 = shalt.err (!%p447_p7)
}
  0x11   :  { %s524_s25 = smov 128   ;;  %s525_s26 = smov 8  }
  0x12   :  { %33 = dma.hbm_to_vmem [thread:$0]  %s631_s1, 2048, %s28_s16, [#allocation7], %s524_s25, %s524_s25, %s525_s26  }
  0x13   :  { %s526_s29 = smov [#allocation3]   ;;  %s527_s5 = smov [#allocation8]  }
  0x14   :  { %s18_s30 = sshll.u32 %s526_s29, 4  ;;  %s39_s6 = sshll.u32 %s527_s5, 4  ;;  %s19_s30 = int_to_ptr.vmem [resolvable:$true] %s18_s30  ;;  %s40_s6 = int_to_ptr.vmem [resolvable:$true] %s39_s6 }
  0x15   :  { %s451_s9 = scalar_lea.hbm %s630_s0, 128 }
  0x16   :  { %p452_p8 = scmp.ne.s32.totalorder %s630_s0, %s451_s9  ;;  %p455_p9 = scmp.lt.u32.totalorder %s451_s9, %s630_s0 }
  0x18   :  { %p457_p10 = pnand %p455_p9, %p452_p8 }
  0x1a   :  { %460 = shalt.err (!%p457_p10)
}
  0x1b   :  { %s461_s1 = scalar_lea.vmem %s19_s30, 128  ;;  %p466_p12 = scmp.lt.s32.totalorder %s19_s30, %s19_s30 }
  0x1c   :  { %p462_p11 = scmp.ne.s32.totalorder %s19_s30, %s461_s1  ;;  %p467_p13 = scmp.lt.s32.totalorder %s461_s1, %s461_s1 }
  0x1e   :  { %p468_p0 = por %p467_p13, %p466_p12 }
  0x20   :  { %p469_p1 = pnand %p468_p0, %p462_p11 }
  0x22   :  { %472 = shalt.err (!%p469_p1)
}
  0x23   :  { %21 = dma.hbm_to_vmem [thread:$0]  %s630_s0, 128, %s19_s30, [#allocation4]  }
  0x24   :  { %s473_s18 = scalar_lea.hbm %s632_s2, 2048 }
  0x25   :  { %p474_p2 = scmp.ne.s32.totalorder %s632_s2, %s473_s18  ;;  %p477_p3 = scmp.lt.u32.totalorder %s473_s18, %s632_s2 }
  0x27   :  { %p479_p4 = pnand %p477_p3, %p474_p2 }
  0x29   :  { %482 = shalt.err (!%p479_p4)
}
  0x2a   :  { %s483_s23 = scalar_lea.vmem %s40_s6, 2048  ;;  %p488_p6 = scmp.lt.s32.totalorder %s40_s6, %s40_s6 }
  0x2b   :  { %p484_p5 = scmp.ne.s32.totalorder %s40_s6, %s483_s23  ;;  %p489_p7 = scmp.lt.s32.totalorder %s483_s23, %s483_s23 }
  0x2d   :  { %p490_p8 = por %p489_p7, %p488_p6 }
  0x2f   :  { %p491_p9 = pnand %p490_p8, %p484_p5 }
  0x31   :  { %494 = shalt.err (!%p491_p9)
}
  0x32   :  { %45 = dma.hbm_to_vmem [thread:$0]  %s632_s2, 2048, %s40_s6, [#allocation7], %s524_s25, %s524_s25, %s525_s26  }
  0x33   :  { %517 = dma.done.wait [#allocation4], 128  }
  0x34   :  { %518 = vsyncadd [#allocation4], 4294967168 }
  0x35   :  { %519 = dma.done.wait [#allocation7], 4096  }
  0x36   :  { %520 = vsyncadd [#allocation7], 4294963200  ;;  %v528_v0 = vmov 0.0|0.0   ;;  %vm529_vm0 = vmmov 0   ;;  %v530_v1 = vmov 0.0   ;;  %v64_v2 = vld [vmem:[#allocation6] sm:$0xff] }
  0x37   :  { %372 = vmatprep.subr.bf16.mxu0 %v528_v0  ;;  %334 = vmatprep.mubr.msk.f32.mxu0 %vm529_vm0, %v530_v1  ;;  %v65_v3 = vld [vmem:[#allocation6 + $0x8] sm:$0xff]  ;;  %v66_v4 = vld [vmem:[#allocation6 + $0x10] sm:$0xff]  ;;  %v67_v6 = vld [vmem:[#allocation6 + $0x18] sm:$0xff]  ;;  %s531_s26 = smov [#allocation9]  }
  0x38   :  { %396 = vmatprep.subr.bf16.mxu1 %v528_v0  ;;  %369 = vmatprep.mubr.msk.f32.mxu1 %vm529_vm0, %v530_v1  ;;  %v373_v5 = vpack.c.bf16 %v65_v3, %v64_v2  ;;  %v376_v7 = vpack.c.bf16 %v67_v6, %v66_v4  ;;  %v68_v8 = vld [vmem:[#allocation6 + $0x20] sm:$0xff]  ;;  %v69_v9 = vld [vmem:[#allocation6 + $0x28] sm:$0xff]  ;;  %v158_v12 = vld [vmem:[#allocation8 + $0x10] sm:$0xff]  ;;  %s257_s27 = sshll.u32 %s531_s26, 4  ;;  %s258_s27 = int_to_ptr.vmem [resolvable:$true] %s257_s27 }
  0x39   :  { %v156_v10 = vld [vmem:[#allocation8] sm:$0xff]  ;;  %v157_v11 = vld [vmem:[#allocation8 + $0x8] sm:$0xff]  ;;  %v159_v13 = vld [vmem:[#allocation8 + $0x18] sm:$0xff]  ;;  %v379_v14 = vpack.c.bf16 %v69_v9, %v68_v8  ;;  %s495_s28 = scalar_lea.vmem %s258_s27, 128  ;;  %p500_p11 = scmp.lt.s32.totalorder %s258_s27, %s258_s27 }
  0x3a   :  { %374 = vmatpush3.bf16.msra.mxu0 %v373_v5  ;;  %v397_v15 = vpack.c.bf16 %v157_v11, %v156_v10  ;;  %v70_v16 = vld [vmem:[#allocation6 + $0x30] sm:$0xff]  ;;  %v71_v17 = vld [vmem:[#allocation6 + $0x38] sm:$0xff]  ;;  %v400_v18 = vpack.c.bf16 %v159_v13, %v158_v12  ;;  %v160_v19 = vld [vmem:[#allocation8 + $0x20] sm:$0xff]  ;;  %p496_p10 = scmp.ne.s32.totalorder %s258_s27, %s495_s28  ;;  %p501_p12 = scmp.lt.s32.totalorder %s495_s28, %s495_s28 }
  0x3b   :  { %375 = vmatprep.subr.bf16.mxu0 %v528_v0  ;;  %v161_v20 = vld [vmem:[#allocation8 + $0x28] sm:$0xff]  ;;  %v382_v21 = vpack.c.bf16 %v71_v17, %v70_v16  ;;  %v72_v22 = vld [vmem:[#allocation6 + $0x40] sm:$0xff]  ;;  %v162_v25 = vld [vmem:[#allocation8 + $0x30] sm:$0xff] }
  0x3c   :  { %398 = vmatpush3.bf16.msra.mxu1 %v397_v15  ;;  %v73_v23 = vld [vmem:[#allocation6 + $0x48] sm:$0xff]  ;;  %v403_v24 = vpack.c.bf16 %v161_v20, %v160_v19  ;;  %v163_v26 = vld [vmem:[#allocation8 + $0x38] sm:$0xff]  ;;  %v74_v28 = vld [vmem:[#allocation6 + $0x50] sm:$0xff]  ;;  %p502_p13 = por %p501_p12, %p500_p11 }
  0x3d   :  { %399 = vmatprep.subr.bf16.mxu1 %v528_v0  ;;  %v385_v27 = vpack.c.bf16 %v73_v23, %v72_v22  ;;  %v75_v29 = vld [vmem:[#allocation6 + $0x58] sm:$0xff]  ;;  %v406_v30 = vpack.c.bf16 %v163_v26, %v162_v25  ;;  %v164_v31 = vld [vmem:[#allocation8 + $0x40] sm:$0xff]  ;;  %v165_v32 = vld [vmem:[#allocation8 + $0x48] sm:$0xff] }
  0x3e   :  { %377 = vmatpush3.bf16.msra.mxu0 %v376_v7  ;;  %v388_v33 = vpack.c.bf16 %v75_v29, %v74_v28  ;;  %v76_v34 = vld [vmem:[#allocation6 + $0x60] sm:$0xff]  ;;  %v77_v35 = vld [vmem:[#allocation6 + $0x68] sm:$0xff]  ;;  %v409_v36 = vpack.c.bf16 %v165_v32, %v164_v31  ;;  %v166_v37 = vld [vmem:[#allocation8 + $0x50] sm:$0xff]  ;;  %p503_p0 = pnand %p502_p13, %p496_p10 }
  0x3f   :  { %378 = vmatprep.subr.bf16.mxu0 %v528_v0  ;;  %v167_v38 = vld [vmem:[#allocation8 + $0x58] sm:$0xff]  ;;  %v391_v39 = vpack.c.bf16 %v77_v35, %v76_v34  ;;  %v78_v40 = vld [vmem:[#allocation6 + $0x70] sm:$0xff]  ;;  %v168_v43 = vld [vmem:[#allocation8 + $0x60] sm:$0xff] }
  0x40   :  { %401 = vmatpush3.bf16.msra.mxu1 %v400_v18  ;;  %v79_v41 = vld [vmem:[#allocation6 + $0x78] sm:$0xff]  ;;  %v412_v42 = vpack.c.bf16 %v167_v38, %v166_v37  ;;  %v169_v44 = vld [vmem:[#allocation8 + $0x68] sm:$0xff]  ;;  %v170_v47 = vld [vmem:[#allocation8 + $0x70] sm:$0xff] }
  0x41   :  { %402 = vmatprep.subr.bf16.mxu1 %v528_v0  ;;  %v394_v45 = vpack.c.bf16 %v79_v41, %v78_v40  ;;  %v415_v46 = vpack.c.bf16 %v169_v44, %v168_v43  ;;  %v171_v48 = vld [vmem:[#allocation8 + $0x78] sm:$0xff] }
  0x42   :  { %380 = vmatpush3.bf16.msra.mxu0 %v379_v14  ;;  %v63_v49 = vld [vmem:[#allocation3] sm:$0xff]  ;;  %v418_v50 = vpack.c.bf16 %v171_v48, %v170_v47 }
  0x43   :  { %381 = vmatprep.subr.bf16.mxu0 %v528_v0  ;;  %v267_v53 = vld [vmem:[%s633_s3] ss:$0 sm:$0xff] }
  0x44   :  { %404 = vmatpush3.bf16.msra.mxu1 %v403_v24 }
  0x45   :  { %405 = vmatprep.subr.bf16.mxu1 %v528_v0 }
  0x46   :  { %383 = vmatpush3.bf16.msra.mxu0 %v382_v21 }
  0x47   :  { %384 = vmatprep.subr.bf16.mxu0 %v528_v0 }
  0x48   :  { %407 = vmatpush3.bf16.msra.mxu1 %v406_v30 }
  0x49   :  { %408 = vmatprep.subr.bf16.mxu1 %v528_v0 }
  0x4a   :  { %386 = vmatpush3.bf16.msra.mxu0 %v385_v27 }
  0x4b   :  { %387 = vmatprep.subr.bf16.mxu0 %v528_v0 }
  0x4c   :  { %410 = vmatpush3.bf16.msra.mxu1 %v409_v36 }
  0x4d   :  { %411 = vmatprep.subr.bf16.mxu1 %v528_v0 }
  0x4e   :  { %389 = vmatpush3.bf16.msra.mxu0 %v388_v33 }
  0x4f   :  { %390 = vmatprep.subr.bf16.mxu0 %v528_v0 }
  0x50   :  { %413 = vmatpush3.bf16.msra.mxu1 %v412_v42 }
  0x51   :  { %414 = vmatprep.subr.bf16.mxu1 %v528_v0 }
  0x52   :  { %392 = vmatpush3.bf16.msra.mxu0 %v391_v39 }
  0x53   :  { %393 = vmatprep.subr.bf16.mxu0 %v528_v0 }
  0x54   :  { %416 = vmatpush3.bf16.msra.mxu1 %v415_v46 }
  0x55   :  { %417 = vmatprep.subr.bf16.mxu1 %v528_v0 }
  0x56   :  { %395 = vmatpush3.bf16.msra.mxu0 %v394_v45 }
  0x58   :  { %419 = vmatpush3.bf16.msra.mxu1 %v418_v50 }
  0x59   :  { %335 = vmatmul.mubr.f32.vlgmr.msra.gmra.mrb[0].mxu0 %v63_v49 }
 0x12c   :  { %v146_v51 = vpop.f32.mrb[0].mxu0 }
 0x12d   :  { %v336_v52 = vpop.f32.mrb[1].mxu0  ;;  %370 = vmatmul.mubr.f32.vlgmr.msra.gmra.mrb[0].mxu1 %v146_v51 }
 0x200   :  { %v245_v54 = vpop.f32.mrb[0].mxu1 }
 0x201   :  { %v246_v55 = vadd.f32 %v267_v53, %v245_v54  ;;  %v371_v56 = vpop.f32.mrb[1].mxu1 }
 0x203   :  { %v249_v57 = vmax.f32 %v246_v55, 0.0 }
 0x205   :  { %250 = vst [vmem:[#allocation9] sm:$0xff] %v249_v57 }
 0x206   :  { %506 = shalt.err (!%p503_p0)
}
 0x207   :  { %s507_s5 = scalar_lea.hbm %s634_s4, 128 }
 0x208   :  { %p508_p1 = scmp.ne.s32.totalorder %s634_s4, %s507_s5  ;;  %p511_p2 = scmp.lt.u32.totalorder %s507_s5, %s634_s4 }
 0x20a   :  { %p513_p3 = pnand %p511_p2, %p508_p1 }
 0x20c   :  { %516 = shalt.err (!%p513_p3)
}
 0x20d   :  { %260 = dma.vmem_to_hbm [thread:$0]  %s258_s27, 128, %s634_s4, [#allocation5]  }
 0x20e   :  { %521 = dma.done.wait [#allocation5], 128  }
 0x20f   :  { %522 = vsyncadd [#allocation5], 4294967168 }
 0x210   :  { %264 = vsyncpa [#allocation4], 1 }
 0x211   :  { %265 = vsyncpa [#allocation7], 1 }
 0x212   :  { %266 = vsyncpa [#allocation5], 1 }

</bundles_post_ra>
